<compile_context>
chip_gen: v5e
topology: v5e:2x2
jax: 0.10.0
libtpu: 0.0.40
codegen_flags: <defaults>
</compile_context>

<pallas_src>
import jax
import jax.numpy as jnp
from jax.experimental import pallas as pl
from jax.experimental.pallas import tpu as pltpu

EPS = 1e-5  # nn.LayerNorm default


def _layernorm_kernel(x_ref, gb_ref, o_ref):
    # x_ref: (C, tile_L) tile — normalize each lane-column over C (sublanes).
    x = x_ref[...].astype(jnp.float32)
    mean = jnp.mean(x, axis=0, keepdims=True)            # (1, tile_L)
    xc = x - mean
    var = jnp.mean(xc * xc, axis=0, keepdims=True)       # biased var (PyTorch LN)
    inv = jax.lax.rsqrt(var + EPS)
    y = xc * inv
    # gb_ref: (2, C, 1) f32 — gamma row 0, beta row 1; broadcast along lanes.
    y = y * gb_ref[0] + gb_ref[1]
    o_ref[...] = y.astype(o_ref.dtype)


def _pick_tile_l(L, C, itemsize, target_block_bytes=2 * 1024 * 1024):
    """Largest lane-dense L-tile (multiple of 128) dividing L within ~2 MiB."""
    max_tile = max(128, target_block_bytes // max(1, C * itemsize))
    max_tile = max(128, (max_tile // 128) * 128)
    if L <= max_tile:
        return L                       # full extent — always a legal block dim
    t = max_tile
    while t >= 128:
        if L % t == 0:
            return t
        t -= 128
    return L                           # fallback: whole L as one block


def layer_norm_proxy(x, gamma, beta):
    """x: (B, C, L). LayerNorm over C (as in LayerNormProxy). Returns (B, C, L)."""
    B, C, L = x.shape
    tile_l = _pick_tile_l(L, C, jnp.dtype(x.dtype).itemsize)
    n_l = L // tile_l

    # Pack gamma/beta into one grid-invariant f32 input: (2, C, 1).
    gb = jnp.stack([gamma, beta]).astype(jnp.float32).reshape(2, C, 1)

    return pl.pallas_call(
        _layernorm_kernel,
        out_shape=jax.ShapeDtypeStruct((B, C, L), x.dtype),
        grid_spec=pltpu.PrefetchScalarGridSpec(
            num_scalar_prefetch=0,
            grid=(B, n_l),
            in_specs=[
                # (None, C, tile_l): batch dim squeezed; kernel sees (C, tile_l).
                pl.BlockSpec((None, C, tile_l), lambda b, l: (b, 0, l)),
                pl.BlockSpec((2, C, 1), lambda b, l: (0, 0, 0)),
            ],
            out_specs=pl.BlockSpec((None, C, tile_l), lambda b, l: (b, 0, l)),
        ),
        compiler_params=pltpu.CompilerParams(
            dimension_semantics=("parallel", "parallel"),
            vmem_limit_bytes=32 * 1024 * 1024,
        ),
    )(x, gb)


def layer_norm_proxy_ref(x, gamma, beta):
    """Pure-JAX reference mirroring the PyTorch module."""
    xt = jnp.transpose(x, (0, 2, 1))  # b c l -> b l c
    mean = jnp.mean(xt, axis=-1, keepdims=True)
    var = jnp.mean((xt - mean) ** 2, axis=-1, keepdims=True)
    y = (xt - mean) / jnp.sqrt(var + EPS) * gamma + beta
    return jnp.transpose(y, (0, 2, 1))  # b l c -> b c l


if __name__ == "__main__":
    key = jax.random.PRNGKey(0)
    kx, kg, kb = jax.random.split(key, 3)

    B, C, L = 2, 32, 256  # small (b, c, l) shapes; L multiple of 128 -> lane-dense

    x = jax.random.normal(kx, (B, C, L), dtype=jnp.float32)
    gamma = 1.0 + 0.1 * jax.random.normal(kg, (C,), dtype=jnp.float32)
    beta = 0.1 * jax.random.normal(kb, (C,), dtype=jnp.float32)

    out = layer_norm_proxy(x, gamma, beta)
    out = jax.block_until_ready(out)

    ref = layer_norm_proxy_ref(x, gamma, beta)
    assert out.shape == (B, C, L)
    assert jnp.allclose(out, ref, atol=1e-5, rtol=1e-5), "mismatch vs reference"

    print("KERNEL_OK")
</pallas_src>

<mosaic_0001>
module attributes {stable_mosaic.version = 11 : i64} {
  func.func @_layernorm_kernel(%arg0: i32, %arg1: i32, %arg2: memref<1x32x256xf32, #tpu.memory_space<vmem>>, %arg3: memref<2x32x1xf32, #tpu.memory_space<vmem>>, %arg4: memref<1x32x256xf32, #tpu.memory_space<vmem>>) attributes {dimension_semantics = [#tpu.dimension_semantics<parallel>, #tpu.dimension_semantics<parallel>], iteration_bounds = array<i64: 2, 1>, scalar_prefetch = 0 : i64, scratch_operands = 0 : i64, tpu.core_type = #tpu.core_type<tc>, window_params = [{transform_indices = @transform_0, window_bounds = array<i64: 1, 32, 256>}, {pipeline_mode = #tpu.pipeline_mode<synchronous>, transform_indices = @transform_1, window_bounds = array<i64: 2, 32, 1>}, {transform_indices = @transform_2, window_bounds = array<i64: 1, 32, 256>}]} {
    %c0 = arith.constant 0 : index
    %c0_0 = arith.constant 0 : index
    %c0_1 = arith.constant 0 : index
    %0 = vector.load %arg2[%c0, %c0_0, %c0_1] : memref<1x32x256xf32, #tpu.memory_space<vmem>>, vector<1x32x256xf32>
    %1 = vector.shape_cast %0 : vector<1x32x256xf32> to vector<32x256xf32>
    %cst = arith.constant dense<0.000000e+00> : vector<256xf32>
    %2 = vector.multi_reduction <add>, %1, %cst [0] : vector<32x256xf32> to vector<256xf32>
    %3 = vector.shape_cast %2 : vector<256xf32> to vector<1x256xf32>
    %cst_2 = arith.constant 3.200000e+01 : f32
    %4 = vector.broadcast %cst_2 : f32 to vector<1x256xf32>
    %5 = arith.divf %3, %4 : vector<1x256xf32>
    %6 = vector.broadcast %5 : vector<1x256xf32> to vector<32x256xf32>
    %7 = arith.subf %1, %6 : vector<32x256xf32>
    %8 = arith.mulf %7, %7 : vector<32x256xf32>
    %cst_3 = arith.constant dense<0.000000e+00> : vector<256xf32>
    %9 = vector.multi_reduction <add>, %8, %cst_3 [0] : vector<32x256xf32> to vector<256xf32>
    %10 = vector.shape_cast %9 : vector<256xf32> to vector<1x256xf32>
    %cst_4 = arith.constant 3.200000e+01 : f32
    %11 = vector.broadcast %cst_4 : f32 to vector<1x256xf32>
    %12 = arith.divf %10, %11 : vector<1x256xf32>
    %cst_5 = arith.constant 9.99999974E-6 : f32
    %13 = vector.broadcast %cst_5 : f32 to vector<1x256xf32>
    %14 = arith.addf %12, %13 : vector<1x256xf32>
    %15 = math.rsqrt %14 : vector<1x256xf32>
    %16 = vector.broadcast %15 : vector<1x256xf32> to vector<32x256xf32>
    %17 = arith.mulf %7, %16 : vector<32x256xf32>
    %c0_6 = arith.constant 0 : index
    %c0_7 = arith.constant 0 : index
    %c0_8 = arith.constant 0 : index
    %18 = vector.load %arg3[%c0_6, %c0_7, %c0_8] : memref<2x32x1xf32, #tpu.memory_space<vmem>>, vector<1x32x1xf32>
    %19 = vector.shape_cast %18 : vector<1x32x1xf32> to vector<32x1xf32>
    %20 = vector.broadcast %19 : vector<32x1xf32> to vector<32x256xf32>
    %21 = arith.mulf %17, %20 : vector<32x256xf32>
    %c1 = arith.constant 1 : index
    %c0_9 = arith.constant 0 : index
    %c0_10 = arith.constant 0 : index
    %22 = vector.load %arg3[%c1, %c0_9, %c0_10] : memref<2x32x1xf32, #tpu.memory_space<vmem>>, vector<1x32x1xf32>
    %23 = vector.shape_cast %22 : vector<1x32x1xf32> to vector<32x1xf32>
    %24 = vector.broadcast %23 : vector<32x1xf32> to vector<32x256xf32>
    %25 = arith.addf %21, %24 : vector<32x256xf32>
    %c0_11 = arith.constant 0 : index
    %c0_12 = arith.constant 0 : index
    %c0_13 = arith.constant 0 : index
    %26 = vector.load %arg4[%c0_11, %c0_12, %c0_13] : memref<1x32x256xf32, #tpu.memory_space<vmem>>, vector<1x32x256xf32>
    %27 = vector.shape_cast %26 : vector<1x32x256xf32> to vector<32x256xf32>
    %28 = vector.shape_cast %25 : vector<32x256xf32> to vector<1x32x256xf32>
    tpu.vector_store %arg4[%c0_11, %c0_12, %c0_13], %28 {strides = array<i32>} : memref<1x32x256xf32, #tpu.memory_space<vmem>>, vector<1x32x256xf32>,
    return
  }
  func.func @transform_0(%arg0: i32, %arg1: i32) -> (i32, i32, i32) {
    %c0_i32 = arith.constant 0 : i32
    %c0_i32_0 = arith.constant 0 : i32
    return %arg0, %c0_i32, %arg1 : i32, i32, i32
  }
  func.func @transform_1(%arg0: i32, %arg1: i32) -> (i32, i32, i32) {
    %c0_i32 = arith.constant 0 : i32
    %c0_i32_0 = arith.constant 0 : i32
    %c0_i32_1 = arith.constant 0 : i32
    %c0_i32_2 = arith.constant 0 : i32
    return %c0_i32, %c0_i32_0, %c0_i32_1 : i32, i32, i32
  }
  func.func @transform_2(%arg0: i32, %arg1: i32) -> (i32, i32, i32) {
    %c0_i32 = arith.constant 0 : i32
    %c0_i32_0 = arith.constant 0 : i32
    return %arg0, %c0_i32, %arg1 : i32, i32, i32
  }
}

</mosaic_0001>

<bundles_post_ra>
// kernel: tpu_custom_call.1
= control target key start
LH: loop header
LB: loop body
LE: loop exit
PB: predicated region body
PF: predicated region fallthrough
CT: control target
= control target key end

     0   :  { %7 = vsyncpa [#allocation3], 0  ;;  %s895_s0 = inlined_call_operand.hbm [shape: f32[2,32,256], index: 0, kind: input, shape index: {}]   ;;  %s896_s1 = inlined_call_operand.vmem [shape: f32[2,32,1], index: 1, kind: input, shape index: {}]   ;;  %s897_s2 = inlined_call_operand.hbm [shape: f32[2,32,256], index: 2, kind: output, shape index: {}]  }
   0x1   :  { %9 = vsyncpa [#allocation3 + $0x1], 0 }
   0x2   :  { %10 = vsyncpa [#allocation4], 0 }
   0x3   :  { %12 = vsyncpa [#allocation4 + $0x1], 0  ;;  %s696_s9 = smov 0   ;;  %s698_s10 = smov 0  }
   0x4   :  { %s700_s11 = smov 0   ;;  %s702_s12 = smov 0  }
   0x5   :  { %s704_s13 = smov 0   ;;  %s706_s14 = smov 0  }
   0x6 LB: > { %s463_s15 = sadd.s32 4294967295, %s673_s14   ;;  %s464_s16 = sadd.s32 4294967294, %s673_s14   ;;  %s673_s14 = sphi %s706_s14, %s18_s14   ;;  %s669_s13 = sphi %s704_s13, %s906_s13   ;;  %s665_s12 = sphi %s702_s12, %s905_s12   ;;  %s661_s11 = sphi %s700_s11, %s904_s11   ;;  %s657_s10 = sphi %s698_s10, %s903_s10   ;;  %s653_s9 = sphi %s696_s9, %s902_s9  }
   0x7   : > { %s30_s17 = sadd.s32 1, %s669_s13  ;;  %s39_s18 = sadd.s32 1, %s661_s11 }
   0x8   : > { %p32_p0 = scmp.ge.s32.totalorder %s30_s17, 2  ;;  %p46_p1 = scmp.ne.s32.totalorder %s661_s11, %s657_s10 }
   0x9   : > { %p47_p2 = scmp.eq.s32.totalorder %s673_s14, 0  ;;  %p52_p3 = scmp.ne.s32.totalorder %s657_s10, %s653_s9 }
   0xa   : > { %s908_s17 = smov (%p32_p0, %s30_s17), 0  ;;  %p53_p5 = scmp.eq.s32.totalorder %s463_s15, 0 }
   0xb   : > { %p737_p4 = por %p47_p2, %p46_p1  ;;  %s34_s20 = ssub.s32 %s669_s13, %s908_s17 }
   0xc   : > { %p99_p6 = scmp.eq.s32.totalorder %s463_s15, 1  ;;  %p37_p7 = scmp.eq.s32.totalorder %s34_s20, 0 }
   0xd   : > { %p743_p8 = por %p53_p5, %p52_p3  ;;  %p105_p10 = scmp.eq.s32.totalorder %s464_s16, 1 }
   0xe   : > { %p747_p9 = por %p99_p6, %p46_p1  ;;  %p466_p12 = scmp.ge.s32.totalorder %s673_s14, 2 }
   0xf   : > { %s752_s23 = scalar_select %p37_p7, %s661_s11, %s39_s18  }
  0x10   : > { %p754_p11 = por %p105_p10, %p52_p3  ;;  %p496_p13 = scmp.lt.s32.totalorder %s673_s14, 2 }
  0x11   : > { %s128_s25 = sand.u32 1, %s661_s11   ;;  %s482_s27 = sshll.u32 %s669_s13, 6 }
  0x12   : > { %s467_s26 = sshll.u32 %s128_s25, 6  ;;  %s139_s30 = scalar_lea.hbm %s895_s0, %s482_s27 }
  0x13   : > { %s132_s3 = scalar_lea.vmem [#allocation2], %s467_s26  ;;  %s140_s5 = sshll.u32 %s139_s30, 4  ;;  %s141_s5 = int_to_ptr.hbm [resolvable:$true] %s140_s5 }
  0x14   : > { %s142_s4 = sshll.u32 %s132_s3, 4  ;;  %p489_p0 = pnand %p496_p13, %p737_p4  ;;  %s143_s4 = int_to_ptr.vmem [resolvable:$true] %s142_s4 }
  0x15   : > { %p470_p1 = scmp.ge.s32.totalorder %s673_s14, 1  ;;  %s129_s6 = scalar_lea.sflag [#allocation3], %s128_s25 }
  0x16   : > { %s675_s7 = smov 256   ;;  %s676_s8 = smov 16  }
  0x17   : > { %491 = dma.hbm_to_vmem [thread:$0]  (!%p489_p0), %s141_s5, 1024, %s143_s4, %s129_s6, %s675_s7, %s675_s7, %s676_s8  }
  0x18   : > { %p150_p2 = scmp.lt.s32.totalorder %s673_s14, 3 }
  0x1a   : > { %p151_p3 = pnand %p470_p1, %p150_p2 }
  0x1b   : > { %s770_s15 = sand.u32 (!%p151_p3), 1, %s657_s10  }
  0x1c   : > { %154 = sbr.rel (%p151_p3) target bundleno = 176 (0xb0), region = 28  ;;  %s471_s16 = sshll.u32 (!%p151_p3), %s770_s15, 6 }
  0x1d   : > { %s157_s18 = scalar_lea.sflag (!%p151_p3), [#allocation3], %s770_s15  ;;  %s776_s19 = scalar_lea.vmem (!%p151_p3), [#allocation2], %s471_s16 }
  0x21   : > { %644 = dma.done.wait (%p743_p8), %s157_s18, 1024  }
  0x22   : > { %646 = vsyncadd (%p743_p8), %s157_s18, 4294966272  ;;  %v677_v0 = vmov 0   ;;  %v287_v1 = vld [vmem:[%s896_s1 + $0x10] sm:$0xff]  ;;  %v285_v2 = vld [vmem:[%s896_s1] sm:$0xff]  ;;  %v678_v17 = vmov 32.0   ;;  %s359_s21 = scalar_lea.sflag [#allocation4], %s770_s15 }
  0x23   : > { %553 = vset.pattern.permute.xlu1 %v677_v0  ;;  %552 = vset.pattern.permute.xlu0 %v677_v0  ;;  %v473_v3 = vld [vmem:[%s896_s1 + $0x20] sm:$0xff]  ;;  %v288_v4 = vld [vmem:[%s896_s1 + $0x18] sm:$0xff]  ;;  %v286_v5 = vld [vmem:[%s896_s1 + $0x8] sm:$0xff]  ;;  %555 = vrcp.f32 %v678_v17  ;;  %s611_s5 = scalar_lea.hbm %s897_s2, 128 }
  0x24   : > { %554 = vset.pattern.permute.xlu2 %v677_v0  ;;  %301 = vperm.xlu1 %553, %v287_v1   ;;  %v474_v6 = vld [vmem:[%s896_s1 + $0x28] sm:$0xff]  ;;  %v476_v7 = vld [vmem:[%s896_s1 + $0x38] sm:$0xff]  ;;  %v475_v8 = vld [vmem:[%s896_s1 + $0x30] sm:$0xff] }
  0x25   : > { %291 = vperm.xlu0 %552, %v285_v2   ;;  %324 = vperm.xlu2 %554, %v473_v3   ;;  %v184_v9 = vld [vmem:[%s776_s19] sm:$0xff]  ;;  %v185_v10 = vld [vmem:[%s776_s19 + $0x8] sm:$0xff]  ;;  %v186_v11 = vld [vmem:[%s776_s19 + $0x10] sm:$0xff] }
  0x26   : > { %v187_v12 = vld [vmem:[%s776_s19 + $0x18] sm:$0xff]  ;;  %v192_v13 = vadd.f32 %v186_v11, %v184_v9  ;;  %v188_v14 = vld [vmem:[%s776_s19 + $0x20] sm:$0xff]  ;;  %v189_v15 = vld [vmem:[%s776_s19 + $0x28] sm:$0xff] }
  0x27   : > { %v201_v16 = vadd.f32 %v187_v12, %v185_v10  ;;  %v190_v19 = vld [vmem:[%s776_s19 + $0x30] sm:$0xff]  ;;  %v191_v20 = vld [vmem:[%s776_s19 + $0x38] sm:$0xff]  ;;  %s840_s19 = scalar_lea.vmem [#allocation5], %s471_s16  ;;  %s483_s16 = sshll.u32 %s665_s12, 6 }
  0x28   : > { %v193_v18 = vadd.f32 %v192_v13, %v188_v14  ;;  %s372_s27 = scalar_lea.hbm %s897_s2, %s483_s16  ;;  %s373_s12 = sshll.u32 %s840_s19, 4  ;;  %s374_s12 = int_to_ptr.vmem [resolvable:$true] %s373_s12 }
  0x29   : > { %v202_v21 = vadd.f32 %v201_v16, %v189_v15  ;;  %v556_v26 = vpop.eup %555  ;;  %s375_s28 = sshll.u32 %s372_s27, 4  ;;  %s376_s28 = int_to_ptr.hbm [resolvable:$true] %s375_s28 }
  0x2a   : > { %v194_v22 = vadd.f32 %v193_v18, %v190_v19  ;;  %v211_v28 = vmul.f32 32.0, %v556_v26  ;;  %vm215_vm0 = vweird.f32 %v556_v26  ;;  %s605_s29 = sshra.s32 %s376_s28, 4  ;;  %s606_s29 = int_to_ptr.hbm [resolvable:$true] %s605_s29 }
  0x2b   : > { %v203_v23 = vadd.f32 %v202_v21, %v191_v20  ;;  %s607_s30 = scalar_lea.hbm %s606_s29, 64  ;;  %p612_p7 = scmp.lt.s32.totalorder %s606_s29, %s897_s2 }
  0x2c   : > { %306 = vperm.xlu1 %553, %v288_v4   ;;  %v195_v24 = vrot.slane %v194_v22, 4  ;;  %v212_v31 = vsub.f32 1.0, %v211_v28  ;;  %p608_p4 = scmp.ne.s32.totalorder %s606_s29, %s607_s30  ;;  %p613_p8 = scmp.lt.s32.totalorder %s611_s5, %s607_s30 }
  0x2d   : > { %296 = vperm.xlu0 %552, %v286_v5   ;;  %329 = vperm.xlu2 %554, %v474_v6   ;;  %v204_v25 = vrot.slane %v203_v23, 4 }
  0x2e   : > { %v196_v27 = vadd.f32 %v195_v24, %v194_v22  ;;  %v213_v34 = vmul.f32 %v556_v26, %v212_v31  ;;  %p609_p5 = pnand %p608_p4, %p747_p9  ;;  %p614_p10 = por %p613_p8, %p612_p7 }
  0x2f   : > { %v205_v29 = vadd.f32 %v204_v25, %v203_v23 }
  0x30   : > { %v197_v30 = vrot.slane %v196_v27, 2  ;;  %v214_v37 = vadd.f32 %v556_v26, %v213_v34  ;;  %p610_p6 = pneg %p609_p5 }
  0x31   : > { %v206_v32 = vrot.slane %v205_v29, 2 }
  0x32   : > { %v198_v33 = vadd.f32 %v197_v30, %v196_v27  ;;  %v216_v40 = vsel %vm215_vm0, %v556_v26, %v214_v37  ;;  %p615_p13 = pnand %p614_p10, %p610_p6 }
  0x33   : > { %v207_v35 = vadd.f32 %v206_v32, %v205_v29 }
  0x34   : > { %339 = vperm.xlu1 %553, %v476_v7   ;;  %v199_v36 = vrot.slane %v198_v33, 1 }
  0x35   : > { %334 = vperm.xlu0 %552, %v475_v8   ;;  %v208_v38 = vrot.slane %v207_v35, 1 }
  0x36   : > { %v200_v39 = vadd.f32 %v199_v36, %v198_v33 }
  0x37   : > { %v209_v41 = vadd.f32 %v208_v38, %v207_v35 }
  0x38   : > { %v217_v42 = vmul.f32 %v216_v40, %v200_v39 }
  0x39   : > { %v218_v43 = vmul.f32 %v216_v40, %v209_v41 }
  0x3a   : > { %v219_v44 = vsub.f32 %v184_v9, %v217_v42  ;;  %v814_v45 = vsub.f32 %v186_v11, %v217_v42  ;;  %v818_v48 = vsub.f32 %v188_v14, %v217_v42  ;;  %v826_v54 = vsub.f32 %v190_v19, %v217_v42 }
  0x3b   : > { %v220_v46 = vsub.f32 %v185_v10, %v218_v43  ;;  %v816_v47 = vsub.f32 %v187_v12, %v218_v43  ;;  %v820_v49 = vsub.f32 %v189_v15, %v218_v43  ;;  %v828_v55 = vsub.f32 %v191_v20, %v218_v43 }
  0x3c   : > { %v227_v50 = vmul.f32 %v219_v44, %v219_v44  ;;  %v229_v51 = vmul.f32 %v814_v45, %v814_v45  ;;  %v231_v56 = vmul.f32 %v818_v48, %v818_v48  ;;  %v233_v60 = vmul.f32 %v826_v54, %v826_v54 }
  0x3d   : > { %v228_v52 = vmul.f32 %v220_v46, %v220_v46  ;;  %v230_v53 = vmul.f32 %v816_v47, %v816_v47  ;;  %v232_v57 = vmul.f32 %v820_v49, %v820_v49  ;;  %v234_v61 = vmul.f32 %v828_v55, %v828_v55 }
  0x3e   : > { %v235_v58 = vadd.f32 %v229_v51, %v227_v50 }
  0x3f   : > { %v244_v59 = vadd.f32 %v230_v53, %v228_v52 }
  0x40   : > { %v236_v62 = vadd.f32 %v235_v58, %v231_v56 }
  0x41   : > { %v245_v63 = vadd.f32 %v244_v59, %v232_v57 }
  0x42   : > { %v237_v0 = vadd.f32 %v236_v62, %v233_v60 }
  0x43   : > { %v246_v1 = vadd.f32 %v245_v63, %v234_v61 }
  0x44   : > { %v238_v2 = vrot.slane %v237_v0, 4 }
  0x45   : > { %v247_v3 = vrot.slane %v246_v1, 4 }
  0x46   : > { %v239_v4 = vadd.f32 %v238_v2, %v237_v0 }
  0x47   : > { %v248_v5 = vadd.f32 %v247_v3, %v246_v1 }
  0x48   : > { %v240_v6 = vrot.slane %v239_v4, 2 }
  0x49   : > { %v249_v7 = vrot.slane %v248_v5, 2 }
  0x4a   : > { %v241_v8 = vadd.f32 %v240_v6, %v239_v4 }
  0x4b   : > { %v250_v9 = vadd.f32 %v249_v7, %v248_v5 }
  0x4c   : > { %v242_v10 = vrot.slane %v241_v8, 1 }
  0x4d   : > { %v251_v11 = vrot.slane %v250_v9, 1 }
  0x4e   : > { %v243_v12 = vadd.f32 %v242_v10, %v241_v8 }
  0x4f   : > { %v252_v13 = vadd.f32 %v251_v11, %v250_v9 }
  0x50   : > { %v253_v14 = vmul.f32 %v243_v12, %v216_v40 }
  0x51   : > { %v254_v15 = vmul.f32 %v252_v13, %v216_v40 }
  0x52   : > { %v255_v16 = vadd.f32 1e-05, %v253_v14 }
  0x53   : > { %v256_v17 = vadd.f32 1e-05, %v254_v15 }
  0x54   : > { %557 = vrsqrt.f32 %v255_v16  ;;  %vm263_vm1 = vweird.f32 %v255_v16 }
  0x55   : > { %559 = vrsqrt.f32 %v256_v17  ;;  %vm273_vm3 = vweird.f32 %v256_v17 }
  0x5a   : > { %v558_v18 = vpop.eup %557 }
  0x5b   : > { %v560_v19 = vpop.eup %559  ;;  %v258_v20 = vmul.f32 %v558_v18, %v255_v16  ;;  %vm264_vm2 = vweird.f32 %v558_v18 }
  0x5c   : > { %v268_v21 = vmul.f32 %v560_v19, %v256_v17  ;;  %vm274_vm4 = vweird.f32 %v560_v19  ;;  %vm265_vm5 = vmor %vm263_vm1, %vm264_vm2 }
  0x5d   : > { %v259_v22 = vmul.f32 %v558_v18, %v258_v20  ;;  %vm275_vm6 = vmor %vm273_vm3, %vm274_vm4 }
  0x5e   : > { %v269_v23 = vmul.f32 %v560_v19, %v268_v21 }
  0x5f   : > { %v260_v24 = vmul.f32 0.5, %v259_v22 }
  0x60   : > { %v270_v25 = vmul.f32 0.5, %v269_v23 }
  0x61   : > { %v261_v26 = vsub.f32 1.5, %v260_v24 }
  0x62   : > { %v271_v27 = vsub.f32 1.5, %v270_v25 }
  0x63   : > { %v262_v28 = vmul.f32 %v558_v18, %v261_v26 }
  0x64   : > { %v272_v29 = vmul.f32 %v560_v19, %v271_v27 }
  0x65   : > { %v266_v30 = vsel %vm265_vm5, %v558_v18, %v262_v28 }
  0x66   : > { %v276_v31 = vsel %vm275_vm6, %v560_v19, %v272_v29  ;;  %v277_v32 = vmul.f32 %v266_v30, %v219_v44  ;;  %v279_v41 = vmul.f32 %v266_v30, %v814_v45  ;;  %v281_v51 = vmul.f32 %v266_v30, %v818_v48 }
  0x67   : > { %v278_v33 = vmul.f32 %v276_v31, %v220_v46  ;;  %v280_v42 = vmul.f32 %v276_v31, %v816_v47  ;;  %v283_v53 = vmul.f32 %v266_v30, %v826_v54  ;;  %v284_v56 = vmul.f32 %v276_v31, %v828_v55 }
  0x68   : > { %v282_v45 = vmul.f32 %v276_v31, %v820_v49 }
  0x7f   : > { %v325_v34 = vpop.permute.xlu2 %324 }
  0x87   : > { %v330_v52 = vpop.permute.xlu2 %329 }
  0x96   : > { %v302_v35 = vpop.permute.xlu1 %301 }
  0x97   : > { %v292_v36 = vpop.permute.xlu0 %291  ;;  %v313_v47 = vmul.f32 %v302_v35, %v281_v51  ;;  %v314_v54 = vmul.f32 %v302_v35, %v282_v45 }
  0x98   : > { %v309_v37 = vmul.f32 %v292_v36, %v277_v32  ;;  %v310_v38 = vmul.f32 %v292_v36, %v278_v33 }
  0x9a   : > { %v342_v39 = vadd.f32 %v325_v34, %v309_v37  ;;  %v343_v40 = vadd.f32 %v325_v34, %v310_v38 }
  0x9c   : > { %350 = vst [vmem:[%s840_s19] sm:$0xff] %v342_v39 }
  0x9d   : > { %351 = vst [vmem:[%s840_s19 + $0x8] sm:$0xff] %v343_v40 }
  0x9e   : > { %v307_v43 = vpop.permute.xlu1 %306 }
  0x9f   : > { %v297_v44 = vpop.permute.xlu0 %296  ;;  %v315_v48 = vmul.f32 %v307_v43, %v283_v53  ;;  %v316_v59 = vmul.f32 %v307_v43, %v284_v56 }
  0xa0   : > { %v311_v46 = vmul.f32 %v297_v44, %v279_v41  ;;  %v312_v50 = vmul.f32 %v297_v44, %v280_v42 }
  0xa2   : > { %v344_v57 = vadd.f32 %v330_v52, %v311_v46  ;;  %v345_v58 = vadd.f32 %v330_v52, %v312_v50 }
  0xa4   : > { %352 = vst [vmem:[%s840_s19 + $0x10] sm:$0xff] %v344_v57 }
  0xa5   : > { %353 = vst [vmem:[%s840_s19 + $0x18] sm:$0xff] %v345_v58 }
  0xa6   : > { %v340_v55 = vpop.permute.xlu1 %339 }
  0xa7   : > { %v335_v60 = vpop.permute.xlu0 %334  ;;  %v348_v49 = vadd.f32 %v340_v55, %v315_v48  ;;  %v349_v61 = vadd.f32 %v340_v55, %v316_v59 }
  0xa8   : > { %v346_v62 = vadd.f32 %v335_v60, %v313_v47  ;;  %v347_v63 = vadd.f32 %v335_v60, %v314_v54 }
  0xa9   : > { %356 = vst [vmem:[%s840_s19 + $0x30] sm:$0xff] %v348_v49 }
  0xaa   : > { %357 = vst [vmem:[%s840_s19 + $0x38] sm:$0xff] %v349_v61 }
  0xab   : > { %354 = vst [vmem:[%s840_s19 + $0x20] sm:$0xff] %v346_v62 }
  0xac   : > { %355 = vst [vmem:[%s840_s19 + $0x28] sm:$0xff] %v347_v63 }
  0xad   : > { %618 = shalt.err (!%p615_p13)
}
  0xae   : > { %s679_s15 = smov 256   ;;  %s680_s8 = smov 16  }
  0xaf   : > { %486 = dma.vmem_to_hbm [thread:$0]  (%p747_p9), %s374_s12, 1024, %s376_s28, %s359_s21, %s679_s15, %s679_s15, %s680_s8  }
  0xb0 PF: > { %s390_s18 = sand.u32 1, %s653_s9   ;;  %p493_p0 = pnand %p466_p12, %p754_p11 }
  0xb1   : > { %s391_s20 = scalar_lea.sflag [#allocation4], %s390_s18 }
  0xb2   : > { %p494_p1 = pneg %p493_p0 }
  0xb4   : > { %648 = dma.done.wait (%p494_p1), %s391_s20, 1024  }
  0xb5   : > { %650 = vsyncadd (%p494_p1), %s391_s20, 4294966272  ;;  %s18_s14 = sadd.s32 1, %s673_s14   ;;  %s902_s9 = smov %s657_s10 }
  0xb6   : > { %p15_p2 = scmp.ge.s32.totalorder %s18_s14, 4   ;;  %s903_s10 = smov %s661_s11 }
  0xb7   : > { %s904_s11 = smov %s752_s23  ;;  %s905_s12 = smov %s669_s13 }
  0xb8   : > { %s906_s13 = smov %s908_s17  ;;  %17 = sbr.rel (!%p15_p2) target bundleno = 6 (0x6), region = 74 }
  0xbd   :  { %397 = vsyncpa [#allocation3], 1 }
  0xbe   :  { %399 = vsyncpa [#allocation3 + $0x1], 1 }
  0xbf   :  { %400 = vsyncpa [#allocation4], 1 }
  0xc0   :  { %402 = vsyncpa [#allocation4 + $0x1], 1 }

</bundles_post_ra>
